<compile_context>
chip_gen: v6e
topology: v6e:2x2x1
jax: 0.10.0
libtpu: 0.0.40
codegen_flags: <defaults>
</compile_context>

<pallas_src>
import functools
import math

import jax
import jax.numpy as jnp
from jax.experimental import pallas as pl
from jax.experimental.pallas import tpu as pltpu


def _round_up(v: int, m: int) -> int:
    return ((v + m - 1) // m) * m


def _cdiv(a: int, b: int) -> int:
    return -(-a // b)


def _vmem_cap_bytes() -> int:
    """Usable VMEM budget: ~75% of physical (leave headroom for compiler scratch)."""
    try:
        phys = int(pltpu.get_tpu_info().vmem_capacity_bytes)
    except Exception:
        phys = 64 << 20  # conservative (v7x-sized) fallback
    return max(phys * 3 // 4, 16 << 20)


def _vmem_estimate(m_tile, b_tile, d_pad, act_bytes, out_bytes, w_bytes,
                   bias_bytes, weight_buffers):
    """Rough VMEM footprint of one grid step (incl. double buffers + f32 temps)."""
    w = weight_buffers * 2 * m_tile * d_pad * d_pad * w_bytes      # w1 + w2 blocks
    bias = 2 * 2 * m_tile * d_pad * bias_bytes                     # b1 + b2
    xin = 2 * m_tile * b_tile * d_pad * act_bytes                  # x block (2 bufs)
    outb = 2 * m_tile * b_tile * d_pad * out_bytes                 # out block (2 bufs)
    inter = 3 * m_tile * b_tile * d_pad * 4                        # f32 h / out temps
    return w + bias + xin + outb + inter


def _make_kernel(leaky_slope: float, acc_dtype=jnp.float32):
    """Fused residual-block kernel. Blocks: x/out (MT, TB, D), w (MT, D, D), b (MT, 1, D)."""

    def kernel(x_ref, w1_ref, b1_ref, w2_ref, b2_ref, o_ref):
        def leaky(v):
            # maximum(v, slope*v) == LeakyReLU for 0 <= slope <= 1
            return jnp.maximum(v, leaky_slope * v)

        wdt = w1_ref.dtype                      # bf16 weight streaming dtype
        x = x_ref[...]                          # (MT, TB, D) in activation dtype

        # linear1 + LeakyReLU  (bf16 MXU path, f32 accumulation)
        h = jnp.einsum("mbi,mio->mbo", x.astype(wdt), w1_ref[...],
                       preferred_element_type=acc_dtype)
        h = leaky(h + b1_ref[...].astype(acc_dtype))

        # linear2 + bias
        out = jnp.einsum("mbi,mio->mbo", h.astype(wdt), w2_ref[...],
                         preferred_element_type=acc_dtype)
        out = out + b2_ref[...].astype(acc_dtype)

        # residual: re-read the resident x block in the epilogue (no f32 copy
        # kept live across both matmuls), then LeakyReLU.
        out = leaky(out + x_ref[...].astype(acc_dtype))

        o_ref[...] = out.astype(o_ref.dtype)

    return kernel


def prepare_params(w1, b1, w2, b2, *, param_dtype=jnp.bfloat16):
    """Pad feature dims to a lane multiple (128) and cast weights to the streaming
    dtype ONCE, hoisted out of the per-call hot path."""
    n_models, d_in, d_out = w1.shape
    assert d_in == d_out, "residual add requires input_dim == output_dim"
    d_pad = _round_up(d_out, 128)
    pd = d_pad - d_out
    w1p = jnp.pad(w1, ((0, 0), (0, pd), (0, pd))).astype(param_dtype)
    w2p = jnp.pad(w2, ((0, 0), (0, pd), (0, pd))).astype(param_dtype)
    b1p = jnp.pad(b1, ((0, 0), (0, 0), (0, pd))).astype(jnp.float32)
    b2p = jnp.pad(b2, ((0, 0), (0, 0), (0, pd))).astype(jnp.float32)
    return w1p, b1p, w2p, b2p


def parallel_residual_block_forward_prepared(x, w1p, b1p, w2p, b2p, *, dim,
                                             leaky_slope: float = 0.01,
                                             act_dtype=jnp.bfloat16,
                                             m_tile: int | None = None,
                                             b_tile: int | None = None):
    """Fused forward using pre-padded / pre-cast params (hot path)."""
    n_models, batch, d_in = x.shape
    assert d_in == dim, "x feature dim must match the layer dim"
    d_pad = w1p.shape[-1]
    assert d_pad == _round_up(dim, 128)
    # max(v, slope*v) trick only equals LeakyReLU for slopes in [0, 1].
    assert 0.0 <= leaky_slope <= 1.0, "leaky_slope must be in [0, 1]"

    cap = _vmem_cap_bytes()
    est = functools.partial(
        _vmem_estimate,
        d_pad=d_pad,
        act_bytes=jnp.dtype(act_dtype).itemsize,
        out_bytes=jnp.dtype(x.dtype).itemsize,
        w_bytes=jnp.dtype(w1p.dtype).itemsize,
        bias_bytes=jnp.dtype(b1p.dtype).itemsize,
    )

    # Large-d fallback: single-buffer the weight blocks if a double-buffered pair
    # can't fit the budget (relevant on v7x's 64 MiB VMEM for d_pad >= ~2.5k).
    weight_buffers = 2
    if est(m_tile=1, b_tile=8, weight_buffers=2) > cap:
        weight_buffers = 1
    # TODO(synk): K/N grid tiling over d_pad (with f32 accumulator scratch) for
    #             dims where even single-buffered whole weights don't fit.

    # ---- batch tile: up to 512 rows, chosen to minimise zero padding ----
    if b_tile is None:
        n_bt = max(1, _cdiv(batch, 512))
        b_tile = _round_up(_cdiv(batch, n_bt), 8)
    b_tile = max(8, _round_up(b_tile, 8))
    while b_tile > 8 and est(m_tile=1, b_tile=b_tile, weight_buffers=weight_buffers) > cap:
        b_tile = max(8, _round_up(b_tile // 2, 8))
    b_pad = _round_up(batch, b_tile)

    # ---- model tile: pack several models per step, gated by the VMEM budget ----
    if m_tile is None:
        m_tile = 1
        for cand in (8, 4, 2):
            if n_models % cand == 0 and est(
                    m_tile=cand, b_tile=b_tile, weight_buffers=weight_buffers) <= cap:
                m_tile = cand
                break
    assert n_models % m_tile == 0, "m_tile must divide n_models"

    # ---- pad + cast activations (bf16 streaming; padded lanes stay exactly 0) ----
    xp = jnp.pad(x, ((0, 0), (0, b_pad - batch), (0, d_pad - dim))).astype(act_dtype)

    grid = (n_models // m_tile, b_pad // b_tile)

    x_spec = pl.BlockSpec((m_tile, b_tile, d_pad), lambda m, b: (m, b, 0))
    if weight_buffers == 1:
        w_spec = pl.BlockSpec((m_tile, d_pad, d_pad), lambda m, b: (m, 0, 0),
                              pipeline_mode=pl.Buffered(1))
    else:
        w_spec = pl.BlockSpec((m_tile, d_pad, d_pad), lambda m, b: (m, 0, 0))
    bias_spec = pl.BlockSpec((m_tile, 1, d_pad), lambda m, b: (m, 0, 0))
    out_spec = pl.BlockSpec((m_tile, b_tile, d_pad), lambda m, b: (m, b, 0))

    vmem_limit = int(min(
        cap,
        max(est(m_tile=m_tile, b_tile=b_tile, weight_buffers=weight_buffers) * 5 // 4
            + (4 << 20), 16 << 20),
    ))

    out_padded = pl.pallas_call(
        _make_kernel(leaky_slope),
        out_shape=jax.ShapeDtypeStruct((n_models, b_pad, d_pad), x.dtype),
        grid_spec=pltpu.PrefetchScalarGridSpec(
            num_scalar_prefetch=0,
            grid=grid,
            in_specs=[x_spec, w_spec, bias_spec, w_spec, bias_spec],
            out_specs=out_spec,
        ),
        compiler_params=pltpu.CompilerParams(
            # No reduction axis -> both grid axes are independent ("parallel",
            # usable for megacore / v7x 2-TC sharding). Weight blocks still stay
            # resident across consecutive batch tiles (same block index).
            dimension_semantics=("parallel", "parallel"),
            vmem_limit_bytes=vmem_limit,
        ),
    )(xp, w1p, b1p, w2p, b2p)

    return out_padded[:, :batch, :dim]


def parallel_residual_block_forward(x, w1, b1, w2, b2, *, leaky_slope: float = 0.01,
                                    param_dtype=jnp.bfloat16, act_dtype=jnp.bfloat16,
                                    m_tile: int | None = None, b_tile: int | None = None):
    """Convenience wrapper: pads/casts params then runs the fused kernel.
    For repeated calls, use prepare_params() once + the *_prepared entry point."""
    params = prepare_params(w1, b1, w2, b2, param_dtype=param_dtype)
    return parallel_residual_block_forward_prepared(
        x, *params, dim=w1.shape[-1], leaky_slope=leaky_slope,
        act_dtype=act_dtype, m_tile=m_tile, b_tile=b_tile)


# ---------------------------------------------------------------------------
# Init + references
# ---------------------------------------------------------------------------
def init_parallel_linear(key, n_models, in_dim, out_dim, dtype=jnp.float32):
    """Matches ParallelLinearLayer init: uniform(-stdv, stdv), stdv = 1/sqrt(in_dim)."""
    stdv = 1.0 / math.sqrt(in_dim)
    kw, kb = jax.random.split(key)
    w = jax.random.uniform(kw, (n_models, in_dim, out_dim), dtype, minval=-stdv, maxval=stdv)
    b = jax.random.uniform(kb, (n_models, 1, out_dim), dtype, minval=-stdv, maxval=stdv)
    return w, b


def reference_forward_f32(x, w1, b1, w2, b2, leaky_slope=0.01):
    """Pure-JAX f32 reference of the PyTorch forward (use_batch_norm=False)."""
    def leaky(v):
        return jnp.maximum(v, leaky_slope * v)
    residual = x
    out = leaky(jnp.einsum("mbi,mio->mbo", x, w1) + b1)
    out = jnp.einsum("mbi,mio->mbo", out, w2) + b2
    return leaky(out + residual)


def reference_forward_matched(x, w1, b1, w2, b2, leaky_slope=0.01, param_dtype=jnp.bfloat16):
    """Pure-JAX reference with the kernel's numerics (bf16 x & weights, f32 acc,
    residual uses the bf16-rounded x)."""
    def leaky(v):
        return jnp.maximum(v, leaky_slope * v)
    xb = x.astype(param_dtype)
    w1c, w2c = w1.astype(param_dtype), w2.astype(param_dtype)
    h = jnp.einsum("mbi,mio->mbo", xb, w1c, preferred_element_type=jnp.float32) + b1
    h = leaky(h)
    out = jnp.einsum("mbi,mio->mbo", h.astype(param_dtype), w2c,
                     preferred_element_type=jnp.float32) + b2
    out = leaky(out + xb.astype(jnp.float32))
    return out.astype(x.dtype)


if __name__ == "__main__":
    # Small shapes consistent with the module: x (n_models, batch, dim),
    # input_dim == output_dim (required by the residual add).
    n_models = 4
    batch = 8
    dim = 32
    leaky_slope = 0.01

    key = jax.random.PRNGKey(0)
    kx, k1, k2 = jax.random.split(key, 3)
    x = jax.random.normal(kx, (n_models, batch, dim), dtype=jnp.float32)
    w1, b1 = init_parallel_linear(k1, n_models, dim, dim)
    w2, b2 = init_parallel_linear(k2, n_models, dim, dim)

    # Hoisted weight preparation (pad to lane multiple + bf16 cast, once).
    prepared = prepare_params(w1, b1, w2, b2)
    prepared = jax.block_until_ready(prepared)

    out = parallel_residual_block_forward_prepared(
        x, *prepared, dim=dim, leaky_slope=leaky_slope)
    out = jax.block_until_ready(out)
    assert out.shape == (n_models, batch, dim), out.shape

    # Bit-comparable reference (same bf16 x/weight, f32-accumulate numerics).
    ref_matched = reference_forward_matched(x, w1, b1, w2, b2, leaky_slope)
    err_m = float(jnp.max(jnp.abs(out - ref_matched)))
    assert jnp.allclose(out, ref_matched, atol=1e-4, rtol=1e-4), f"matched-ref max diff {err_m}"

    # Sanity check against the full-f32 PyTorch-equivalent reference
    # (loose tolerance: activations and weights are streamed as bf16).
    ref_f32 = reference_forward_f32(x, w1, b1, w2, b2, leaky_slope)
    err_f = float(jnp.max(jnp.abs(out - ref_f32)))
    assert jnp.allclose(out, ref_f32, atol=5e-2, rtol=5e-2), f"f32-ref max diff {err_f}"

    print("KERNEL_OK")
</pallas_src>

<mosaic_0001>
module attributes {stable_mosaic.version = 11 : i64} {
  func.func @kernel(%arg0: i32, %arg1: i32, %arg2: memref<4x8x128xbf16, #tpu.memory_space<vmem>>, %arg3: memref<4x128x128xbf16, #tpu.memory_space<vmem>>, %arg4: memref<4x1x128xf32, #tpu.memory_space<vmem>>, %arg5: memref<4x128x128xbf16, #tpu.memory_space<vmem>>, %arg6: memref<4x1x128xf32, #tpu.memory_space<vmem>>, %arg7: memref<4x8x128xf32, #tpu.memory_space<vmem>>) attributes {dimension_semantics = [#tpu.dimension_semantics<parallel>, #tpu.dimension_semantics<parallel>], iteration_bounds = array<i64: 1, 1>, scalar_prefetch = 0 : i64, scratch_operands = 0 : i64, tpu.core_type = #tpu.core_type<tc>, window_params = [{transform_indices = @transform_0, window_bounds = array<i64: 4, 8, 128>}, {transform_indices = @transform_1, window_bounds = array<i64: 4, 128, 128>}, {transform_indices = @transform_2, window_bounds = array<i64: 4, 1, 128>}, {transform_indices = @transform_3, window_bounds = array<i64: 4, 128, 128>}, {transform_indices = @transform_4, window_bounds = array<i64: 4, 1, 128>}, {transform_indices = @transform_5, window_bounds = array<i64: 4, 8, 128>}]} {
    %c0 = arith.constant 0 : index
    %c0_0 = arith.constant 0 : index
    %c0_1 = arith.constant 0 : index
    %0 = vector.load %arg2[%c0, %c0_0, %c0_1] : memref<4x8x128xbf16, #tpu.memory_space<vmem>>, vector<4x8x128xbf16>
    %c0_2 = arith.constant 0 : index
    %c0_3 = arith.constant 0 : index
    %c0_4 = arith.constant 0 : index
    %1 = vector.load %arg3[%c0_2, %c0_3, %c0_4] : memref<4x128x128xbf16, #tpu.memory_space<vmem>>, vector<4x128x128xbf16>
    "tpu.trace_start"() <{level = 10 : i32, message = "mbi,mio->mbo"}> : () -> ()
    %cst = arith.constant dense<0.000000e+00> : vector<4x8x128xf32>
    %2 = tpu.matmul %0, %1, %cst {dimension_numbers = #tpu.dot_dimension_numbers<[2], [1], [1], [2], [0, 0, 0, 1, 1, 2], [0], [0]>} : vector<4x8x128xbf16>, vector<4x128x128xbf16>, vector<4x8x128xf32> -> vector<4x8x128xf32>
    "tpu.trace_stop"() : () -> ()
    %c0_5 = arith.constant 0 : index
    %c0_6 = arith.constant 0 : index
    %c0_7 = arith.constant 0 : index
    %3 = vector.load %arg4[%c0_5, %c0_6, %c0_7] : memref<4x1x128xf32, #tpu.memory_space<vmem>>, vector<4x1x128xf32>
    %4 = vector.broadcast %3 : vector<4x1x128xf32> to vector<4x8x128xf32>
    %5 = arith.addf %2, %4 : vector<4x8x128xf32>
    %cst_8 = arith.constant 0.00999999977 : f32
    %6 = vector.broadcast %cst_8 : f32 to vector<4x8x128xf32>
    %7 = arith.mulf %6, %5 : vector<4x8x128xf32>
    %8 = arith.maximumf %5, %7 : vector<4x8x128xf32>
    %9 = arith.truncf %8 : vector<4x8x128xf32> to vector<4x8x128xbf16>
    %c0_9 = arith.constant 0 : index
    %c0_10 = arith.constant 0 : index
    %c0_11 = arith.constant 0 : index
    %10 = vector.load %arg5[%c0_9, %c0_10, %c0_11] : memref<4x128x128xbf16, #tpu.memory_space<vmem>>, vector<4x128x128xbf16>
    "tpu.trace_start"() <{level = 10 : i32, message = "mbi,mio->mbo"}> : () -> ()
    %cst_12 = arith.constant dense<0.000000e+00> : vector<4x8x128xf32>
    %11 = tpu.matmul %9, %10, %cst_12 {dimension_numbers = #tpu.dot_dimension_numbers<[2], [1], [1], [2], [0, 0, 0, 1, 1, 2], [0], [0]>} : vector<4x8x128xbf16>, vector<4x128x128xbf16>, vector<4x8x128xf32> -> vector<4x8x128xf32>
    "tpu.trace_stop"() : () -> ()
    %c0_13 = arith.constant 0 : index
    %c0_14 = arith.constant 0 : index
    %c0_15 = arith.constant 0 : index
    %12 = vector.load %arg6[%c0_13, %c0_14, %c0_15] : memref<4x1x128xf32, #tpu.memory_space<vmem>>, vector<4x1x128xf32>
    %13 = vector.broadcast %12 : vector<4x1x128xf32> to vector<4x8x128xf32>
    %14 = arith.addf %11, %13 : vector<4x8x128xf32>
    %c0_16 = arith.constant 0 : index
    %c0_17 = arith.constant 0 : index
    %c0_18 = arith.constant 0 : index
    %15 = vector.load %arg2[%c0_16, %c0_17, %c0_18] : memref<4x8x128xbf16, #tpu.memory_space<vmem>>, vector<4x8x128xbf16>
    %16 = arith.extf %15 : vector<4x8x128xbf16> to vector<4x8x128xf32>
    %17 = arith.addf %14, %16 : vector<4x8x128xf32>
    %cst_19 = arith.constant 0.00999999977 : f32
    %18 = vector.broadcast %cst_19 : f32 to vector<4x8x128xf32>
    %19 = arith.mulf %18, %17 : vector<4x8x128xf32>
    %20 = arith.maximumf %17, %19 : vector<4x8x128xf32>
    %c0_20 = arith.constant 0 : index
    %c0_21 = arith.constant 0 : index
    %c0_22 = arith.constant 0 : index
    %21 = vector.load %arg7[%c0_20, %c0_21, %c0_22] : memref<4x8x128xf32, #tpu.memory_space<vmem>>, vector<4x8x128xf32>
    tpu.vector_store %arg7[%c0_20, %c0_21, %c0_22], %20 {strides = array<i32>} : memref<4x8x128xf32, #tpu.memory_space<vmem>>, vector<4x8x128xf32>,
    return
  }
  func.func @transform_0(%arg0: i32, %arg1: i32) -> (i32, i32, i32) {
    %c0_i32 = arith.constant 0 : i32
    %c0_i32_0 = arith.constant 0 : i32
    return %arg0, %arg1, %c0_i32 : i32, i32, i32
  }
  func.func @transform_1(%arg0: i32, %arg1: i32) -> (i32, i32, i32) {
    %c0_i32 = arith.constant 0 : i32
    %c0_i32_0 = arith.constant 0 : i32
    %c0_i32_1 = arith.constant 0 : i32
    return %arg0, %c0_i32, %c0_i32_0 : i32, i32, i32
  }
  func.func @transform_2(%arg0: i32, %arg1: i32) -> (i32, i32, i32) {
    %c0_i32 = arith.constant 0 : i32
    %c0_i32_0 = arith.constant 0 : i32
    %c0_i32_1 = arith.constant 0 : i32
    return %arg0, %c0_i32, %c0_i32_0 : i32, i32, i32
  }
  func.func @transform_3(%arg0: i32, %arg1: i32) -> (i32, i32, i32) {
    %c0_i32 = arith.constant 0 : i32
    %c0_i32_0 = arith.constant 0 : i32
    %c0_i32_1 = arith.constant 0 : i32
    return %arg0, %c0_i32, %c0_i32_0 : i32, i32, i32
  }
  func.func @transform_4(%arg0: i32, %arg1: i32) -> (i32, i32, i32) {
    %c0_i32 = arith.constant 0 : i32
    %c0_i32_0 = arith.constant 0 : i32
    %c0_i32_1 = arith.constant 0 : i32
    return %arg0, %c0_i32, %c0_i32_0 : i32, i32, i32
  }
  func.func @transform_5(%arg0: i32, %arg1: i32) -> (i32, i32, i32) {
    %c0_i32 = arith.constant 0 : i32
    %c0_i32_0 = arith.constant 0 : i32
    return %arg0, %arg1, %c0_i32 : i32, i32, i32
  }
}

</mosaic_0001>

<bundles_post_ra>
// kernel: tpu_custom_call.1
= control target key start
LH: loop header
LB: loop body
LE: loop exit
PB: predicated region body
PF: predicated region fallthrough
CT: control target
= control target key end

     0   :  { %10 = vsyncpa [#allocation3], 0  ;;  %s1681_s0 = inlined_call_operand.hbm [shape: bf16[4,8,128], index: 0, kind: input, shape index: {}]   ;;  %s1682_s1 = inlined_call_operand.hbm [shape: bf16[4,128,128], index: 1, kind: input, shape index: {}]   ;;  %s1683_s2 = inlined_call_operand.hbm [shape: f32[4,1,128], index: 2, kind: input, shape index: {}]   ;;  %s1684_s3 = inlined_call_operand.hbm [shape: bf16[4,128,128], index: 3, kind: input, shape index: {}]   ;;  %s1685_s4 = inlined_call_operand.vmem [shape: f32[4,1,128], index: 4, kind: input, shape index: {}]   ;;  %s1686_s5 = inlined_call_operand.hbm [shape: f32[4,8,128], index: 5, kind: output, shape index: {}]  }
   0x1   :  { %11 = vsyncpa [#allocation6], 0 }
   0x2   :  { %12 = vsyncpa [#allocation9], 0 }
   0x3   :  { %13 = vsyncpa [#allocation4], 0  ;;  %s1522_s18 = smov [#allocation5]   ;;  %s1523_s20 = smov [#allocation2]  }
   0x4   :  { %s31_s19 = sshll.u32 %s1522_s18, 4  ;;  %s19_s21 = sshll.u32 %s1523_s20, 4  ;;  %s32_s19 = int_to_ptr.vmem [resolvable:$true] %s31_s19  ;;  %s20_s21 = int_to_ptr.vmem [resolvable:$true] %s19_s21 }
   0x5   :  { %s1422_s22 = scalar_lea.vmem %s32_s19, 4096  ;;  %p1427_p1 = scmp.lt.s32.totalorder %s32_s19, %s32_s19 }
   0x6   :  { %p1423_p0 = scmp.ne.s32.totalorder %s32_s19, %s1422_s22  ;;  %p1428_p2 = scmp.lt.s32.totalorder %s1422_s22, %s1422_s22 }
   0x8   :  { %p1429_p3 = por %p1428_p2, %p1427_p1 }
   0xa   :  { %p1430_p4 = pnand %p1429_p3, %p1423_p0 }
   0xc   :  { %1433 = shalt.err (!%p1430_p4)
}
   0xd   :  { %s1524_s23 = smov 64   ;;  %s1525_s24 = smov 4  }
   0xe   :  { %37 = dma.hbm_to_vmem [thread:$0]  %s1682_s1, 4096, %s32_s19, [#allocation6], %s1524_s23, %s1524_s23, %s1525_s24  }
   0xf   :  { %s1442_s27 = scalar_lea.vmem %s20_s21, 256  ;;  %p1447_p6 = scmp.lt.s32.totalorder %s20_s21, %s20_s21 }
  0x10   :  { %p1443_p5 = scmp.ne.s32.totalorder %s20_s21, %s1442_s27  ;;  %p1448_p7 = scmp.lt.s32.totalorder %s1442_s27, %s1442_s27 }
  0x12   :  { %p1449_p8 = por %p1448_p7, %p1447_p6 }
  0x14   :  { %p1450_p9 = pnand %p1449_p8, %p1443_p5 }
  0x16   :  { %1453 = shalt.err (!%p1450_p9)
}
  0x17   :  { %25 = dma.hbm_to_vmem [thread:$0]  %s1681_s0, 256, %s20_s21, [#allocation3], %s1524_s23, %s1524_s23, %s1525_s24  }
  0x18   :  { %s1526_s30 = smov [#allocation7]  }
  0x19   :  { %s43_s6 = sshll.u32 %s1526_s30, 4  ;;  %s44_s6 = int_to_ptr.vmem [resolvable:$true] %s43_s6 }
  0x1a   :  { %s1462_s7 = scalar_lea.vmem %s44_s6, 64  ;;  %p1467_p11 = scmp.lt.s32.totalorder %s44_s6, %s44_s6 }
  0x1b   :  { %p1463_p10 = scmp.ne.s32.totalorder %s44_s6, %s1462_s7  ;;  %p1468_p12 = scmp.lt.s32.totalorder %s1462_s7, %s1462_s7 }
  0x1d   :  { %p1469_p13 = por %p1468_p12, %p1467_p11 }
  0x1f   :  { %p1470_p0 = pnand %p1469_p13, %p1463_p10 }
  0x21   :  { %1473 = shalt.err (!%p1470_p0)
}
  0x22   :  { %s1527_s1 = smov 16   ;;  %s1528_s8 = smov 1  }
  0x23   :  { %49 = dma.hbm_to_vmem [thread:$0]  %s1683_s2, 64, %s44_s6, [#allocation6], %s1527_s1, %s1527_s1, %s1528_s8  }
  0x24   :  { %s1529_s11 = smov [#allocation8]  }
  0x25   :  { %s55_s12 = sshll.u32 %s1529_s11, 4  ;;  %s56_s12 = int_to_ptr.vmem [resolvable:$true] %s55_s12 }
  0x26   :  { %s1482_s0 = scalar_lea.vmem %s56_s12, 4096  ;;  %p1487_p2 = scmp.lt.s32.totalorder %s56_s12, %s56_s12 }
  0x27   :  { %p1483_p1 = scmp.ne.s32.totalorder %s56_s12, %s1482_s0  ;;  %p1488_p3 = scmp.lt.s32.totalorder %s1482_s0, %s1482_s0 }
  0x29   :  { %p1489_p4 = por %p1488_p3, %p1487_p2 }
  0x2b   :  { %p1490_p5 = pnand %p1489_p4, %p1483_p1 }
  0x2d   :  { %1493 = shalt.err (!%p1490_p5)
}
  0x2e   :  { %61 = dma.hbm_to_vmem [thread:$0]  %s1684_s3, 4096, %s56_s12, [#allocation9], %s1524_s23, %s1524_s23, %s1525_s24  }
  0x2f   :  { %1514 = dma.done.wait [#allocation3], 256  }
  0x30   :  { %1515 = vsyncadd [#allocation3], 4294967040 }
  0x31   :  { %1516 = dma.done.wait [#allocation6], 4160  }
  0x32   :  { %1517 = vsyncadd [#allocation6], 4294963136 }
  0x33   :  { %1518 = dma.done.wait [#allocation9], 4096  }
  0x34   :  { %1519 = vsyncadd [#allocation9], 4294963200  ;;  %v1530_v0 = vmov 0.0   ;;  %vm1531_vm0 = vmmov 0   ;;  %v1350_v1 = vld [vmem:[#allocation5 + $0x38] sm:$0xff]   ;;  %v1352_v3 = vld [vmem:[#allocation5 + $0x30] sm:$0xff]  }
  0x35   :  { %1177 = vmatprep.subr.bf16.mxu0 %v1530_v0  ;;  %1197 = vmatprep.subr.bf16.mxu1 %v1530_v0  ;;  %v1351_v2 = vld [vmem:[#allocation5 + $0x78] sm:$0xff]   ;;  %v1353_v4 = vld [vmem:[#allocation5 + $0x70] sm:$0xff]   ;;  %v1354_v5 = vld [vmem:[#allocation5 + $0x28] sm:$0xff]   ;;  %s1532_s21 = smov [#allocation10]  }
  0x36   :  { %1193 = vmatprep.mubr.msk.bf16.mxu0 %vm1531_vm0, %v1530_v0  ;;  %1213 = vmatprep.mubr.msk.bf16.mxu1 %vm1531_vm0, %v1530_v0  ;;  %v1355_v6 = vld [vmem:[#allocation5 + $0x68] sm:$0xff]   ;;  %v1356_v7 = vld [vmem:[#allocation5 + $0x20] sm:$0xff]   ;;  %v1358_v9 = vld [vmem:[#allocation5 + $0x18] sm:$0xff]   ;;  %s1010_s22 = sshll.u32 %s1532_s21, 4  ;;  %s1011_s22 = int_to_ptr.vmem [resolvable:$true] %s1010_s22 }
  0x37   :  { %1178 = vmatpush3.bf16.msra.mxu0 %v1350_v1  ;;  %1198 = vmatpush3.bf16.msra.mxu1 %v1351_v2  ;;  %v1357_v8 = vld [vmem:[#allocation5 + $0x60] sm:$0xff]   ;;  %v1359_v10 = vld [vmem:[#allocation5 + $0x58] sm:$0xff]   ;;  %v1360_v11 = vld [vmem:[#allocation5 + $0x10] sm:$0xff]   ;;  %p1499_p7 = scmp.lt.s32.totalorder %s1011_s22, %s1011_s22 }
  0x38   :  { %1179 = vmatprep.subr.bf16.mxu0 %v1530_v0  ;;  %1199 = vmatprep.subr.bf16.mxu1 %v1530_v0  ;;  %v1361_v12 = vld [vmem:[#allocation5 + $0x50] sm:$0xff]   ;;  %v1362_v13 = vld [vmem:[#allocation5 + $0x8] sm:$0xff]   ;;  %v1364_v15 = vld [vmem:[#allocation5] sm:$0xff]  }
  0x39   :  { %v1363_v14 = vld [vmem:[#allocation5 + $0x48] sm:$0xff]   ;;  %v1365_v16 = vld [vmem:[#allocation5 + $0x40] sm:$0xff]   ;;  %v77_v17 = vld [vmem:[#allocation2] sm:$0xf] }
  0x3a   :  { %v78_v18 = vld [vmem:[#allocation2 + $0x4] sm:$0xf]  ;;  %v1366_v19 = vld [vmem:[#allocation5 + $0xb8] sm:$0xff]   ;;  %v1370_v23 = vld [vmem:[#allocation5 + $0xa8] sm:$0xff]  }
  0x3b   :  { %1180 = vmatpush3.bf16.msra.mxu0 %v1352_v3  ;;  %1200 = vmatpush3.bf16.msra.mxu1 %v1353_v4  ;;  %v1367_v20 = vld [vmem:[#allocation5 + $0xf8] sm:$0xff]   ;;  %v1368_v21 = vld [vmem:[#allocation5 + $0xb0] sm:$0xff]   ;;  %v1371_v24 = vld [vmem:[#allocation5 + $0xe8] sm:$0xff]  }
  0x3c   :  { %1181 = vmatprep.subr.bf16.mxu0 %v1530_v0  ;;  %1201 = vmatprep.subr.bf16.mxu1 %v1530_v0  ;;  %v1369_v22 = vld [vmem:[#allocation5 + $0xf0] sm:$0xff]   ;;  %v1372_v25 = vld [vmem:[#allocation5 + $0xa0] sm:$0xff]   ;;  %v1374_v27 = vld [vmem:[#allocation5 + $0x98] sm:$0xff]  }
  0x3d   :  { %v1373_v26 = vld [vmem:[#allocation5 + $0xe0] sm:$0xff]   ;;  %v1375_v28 = vld [vmem:[#allocation5 + $0xd8] sm:$0xff]   ;;  %v1376_v29 = vld [vmem:[#allocation5 + $0x90] sm:$0xff]  }
  0x3e   :  { %v1377_v30 = vld [vmem:[#allocation5 + $0xd0] sm:$0xff]   ;;  %v1378_v31 = vld [vmem:[#allocation5 + $0x88] sm:$0xff]   ;;  %v1380_v33 = vld [vmem:[#allocation5 + $0x80] sm:$0xff]  }
  0x3f   :  { %1182 = vmatpush3.bf16.msra.mxu0 %v1354_v5  ;;  %1202 = vmatpush3.bf16.msra.mxu1 %v1355_v6  ;;  %v1379_v32 = vld [vmem:[#allocation5 + $0xc8] sm:$0xff]   ;;  %v1381_v34 = vld [vmem:[#allocation5 + $0xc0] sm:$0xff]   ;;  %v79_v35 = vld [vmem:[#allocation2 + $0x8] sm:$0xf] }
  0x40   :  { %1183 = vmatprep.subr.bf16.mxu0 %v1530_v0  ;;  %1203 = vmatprep.subr.bf16.mxu1 %v1530_v0  ;;  %v1382_v36 = vld [vmem:[#allocation8 + $0x38] sm:$0xff]   ;;  %v1384_v39 = vld [vmem:[#allocation8 + $0x30] sm:$0xff]   ;;  %v1386_v41 = vld [vmem:[#allocation8 + $0x28] sm:$0xff]  }
  0x41   :  { %v80_v37 = vld [vmem:[#allocation2 + $0xc] sm:$0xf]  ;;  %v1385_v40 = vld [vmem:[#allocation8 + $0x70] sm:$0xff]   ;;  %v1387_v42 = vld [vmem:[#allocation8 + $0x68] sm:$0xff]  }
  0x42   :  { %v1383_v38 = vld [vmem:[#allocation8 + $0x78] sm:$0xff]   ;;  %v1388_v43 = vld [vmem:[#allocation8 + $0x20] sm:$0xff]   ;;  %v1392_v47 = vld [vmem:[#allocation8 + $0x10] sm:$0xff]  }
  0x43   :  { %1184 = vmatpush3.bf16.msra.mxu0 %v1356_v7  ;;  %1204 = vmatpush3.bf16.msra.mxu1 %v1357_v8  ;;  %v1389_v44 = vld [vmem:[#allocation8 + $0x60] sm:$0xff]   ;;  %v1390_v45 = vld [vmem:[#allocation8 + $0x18] sm:$0xff]   ;;  %v1393_v48 = vld [vmem:[#allocation8 + $0x50] sm:$0xff]  }
  0x44   :  { %1185 = vmatprep.subr.bf16.mxu0 %v1530_v0  ;;  %1205 = vmatprep.subr.bf16.mxu1 %v1530_v0  ;;  %v1391_v46 = vld [vmem:[#allocation8 + $0x58] sm:$0xff]   ;;  %v1394_v49 = vld [vmem:[#allocation8 + $0x8] sm:$0xff]   ;;  %v1396_v51 = vld [vmem:[#allocation8] sm:$0xff]  }
  0x45   :  { %v1395_v50 = vld [vmem:[#allocation8 + $0x48] sm:$0xff]   ;;  %v1397_v52 = vld [vmem:[#allocation8 + $0x40] sm:$0xff]   ;;  %v1024_v53 = vld [vmem:[#allocation7] ss:$0 sm:$0xff] }
  0x46   :  { %v1025_v54 = vld [vmem:[#allocation7 + $0x1] ss:$0 sm:$0xff] }
  0x47   :  { %1186 = vmatpush3.bf16.msra.mxu0 %v1358_v9  ;;  %1206 = vmatpush3.bf16.msra.mxu1 %v1359_v10  ;;  %v1398_v5 = vld [vmem:[#allocation8 + $0xb8] sm:$0xff]   ;;  %v1400_v10 = vld [vmem:[#allocation8 + $0xb0] sm:$0xff]  }
  0x48   :  { %1187 = vmatprep.subr.bf16.mxu0 %v1530_v0  ;;  %1207 = vmatprep.subr.bf16.mxu1 %v1530_v0  ;;  %v1399_v8 = vld [vmem:[#allocation8 + $0xf8] sm:$0xff]  }
  0x4b   :  { %1188 = vmatpush3.bf16.msra.mxu0 %v1360_v11  ;;  %1208 = vmatpush3.bf16.msra.mxu1 %v1361_v12  ;;  %v1401_v11 = vld [vmem:[#allocation8 + $0xf0] sm:$0xff]   ;;  %v1402_v12 = vld [vmem:[#allocation8 + $0xa8] sm:$0xff]  }
  0x4c   :  { %1189 = vmatprep.subr.bf16.mxu0 %v1530_v0  ;;  %1209 = vmatprep.subr.bf16.mxu1 %v1530_v0 }
  0x4f   :  { %1190 = vmatpush3.bf16.msra.mxu0 %v1362_v13  ;;  %1210 = vmatpush3.bf16.msra.mxu1 %v1363_v14  ;;  %v1403_v13 = vld [vmem:[#allocation8 + $0xe8] sm:$0xff]   ;;  %v1404_v14 = vld [vmem:[#allocation8 + $0xa0] sm:$0xff]  }
  0x50   :  { %1191 = vmatprep.subr.bf16.mxu0 %v1530_v0  ;;  %1211 = vmatprep.subr.bf16.mxu1 %v1530_v0 }
  0x53   :  { %1192 = vmatpush3.bf16.msra.mxu0 %v1364_v15  ;;  %1212 = vmatpush3.bf16.msra.mxu1 %v1365_v16  ;;  %v1405_v15 = vld [vmem:[#allocation8 + $0xe0] sm:$0xff]   ;;  %v1406_v16 = vld [vmem:[#allocation8 + $0x98] sm:$0xff]  }
  0x54   :  { %1217 = vmatprep.subr.bf16.mxu0 %v1530_v0  ;;  %1237 = vmatprep.subr.bf16.mxu1 %v1530_v0 }
  0x56   :  { %1194 = vmatmul.mubr.bf16.vlgmr.msra.gmra.mxu0 %v77_v17  ;;  %1214 = vmatmul.mubr.bf16.vlgmr.msra.gmra.mxu1 %v78_v18  ;;  %v1407_v17 = vld [vmem:[#allocation8 + $0xd8] sm:$0xff]   ;;  %v1408_v18 = vld [vmem:[#allocation8 + $0x90] sm:$0xff]  }
  0x57   :  { %1218 = vmatpush3.bf16.msra.mxu0 %v1366_v19  ;;  %1238 = vmatpush3.bf16.msra.mxu1 %v1367_v20  ;;  %v1409_v19 = vld [vmem:[#allocation8 + $0xd0] sm:$0xff]   ;;  %v1026_v20 = vld [vmem:[#allocation7 + $0x2] ss:$0 sm:$0xff] }
  0x58   :  { %1219 = vmatprep.subr.bf16.mxu0 %v1530_v0  ;;  %1239 = vmatprep.subr.bf16.mxu1 %v1530_v0 }
  0x59   :  { %1233 = vmatprep.mubr.msk.bf16.mxu0 %vm1531_vm0, %v1530_v0  ;;  %1253 = vmatprep.mubr.msk.bf16.mxu1 %vm1531_vm0, %v1530_v0 }
  0x5b   :  { %1220 = vmatpush3.bf16.msra.mxu0 %v1368_v21  ;;  %1240 = vmatpush3.bf16.msra.mxu1 %v1369_v22  ;;  %v1410_v21 = vld [vmem:[#allocation8 + $0x88] sm:$0xff]   ;;  %v1027_v22 = vld [vmem:[#allocation7 + $0x3] ss:$0 sm:$0xff] }
  0x5c   :  { %1221 = vmatprep.subr.bf16.mxu0 %v1530_v0  ;;  %1241 = vmatprep.subr.bf16.mxu1 %v1530_v0 }
  0x5f   :  { %1222 = vmatpush3.bf16.msra.mxu0 %v1370_v23  ;;  %1242 = vmatpush3.bf16.msra.mxu1 %v1371_v24  ;;  %v1411_v23 = vld [vmem:[#allocation8 + $0xc8] sm:$0xff]  }
  0x60   :  { %1223 = vmatprep.subr.bf16.mxu0 %v1530_v0  ;;  %1243 = vmatprep.subr.bf16.mxu1 %v1530_v0 }
  0x63   :  { %1224 = vmatpush3.bf16.msra.mxu0 %v1372_v25  ;;  %1244 = vmatpush3.bf16.msra.mxu1 %v1373_v26 }
  0x64   :  { %1225 = vmatprep.subr.bf16.mxu0 %v1530_v0  ;;  %1245 = vmatprep.subr.bf16.mxu1 %v1530_v0 }
  0x67   :  { %1226 = vmatpush3.bf16.msra.mxu0 %v1374_v27  ;;  %1246 = vmatpush3.bf16.msra.mxu1 %v1375_v28 }
  0x68   :  { %1227 = vmatprep.subr.bf16.mxu0 %v1530_v0  ;;  %1247 = vmatprep.subr.bf16.mxu1 %v1530_v0 }
  0x6b   :  { %1228 = vmatpush3.bf16.msra.mxu0 %v1376_v29  ;;  %1248 = vmatpush3.bf16.msra.mxu1 %v1377_v30  ;;  %v1412_v29 = vld [vmem:[#allocation8 + $0x80] sm:$0xff]  }
  0x6c   :  { %1229 = vmatprep.subr.bf16.mxu0 %v1530_v0  ;;  %1249 = vmatprep.subr.bf16.mxu1 %v1530_v0 }
  0x6f   :  { %1230 = vmatpush3.bf16.msra.mxu0 %v1378_v31  ;;  %1250 = vmatpush3.bf16.msra.mxu1 %v1379_v32  ;;  %v1413_v32 = vld [vmem:[#allocation8 + $0xc0] sm:$0xff]  }
  0x70   :  { %1231 = vmatprep.subr.bf16.mxu0 %v1530_v0  ;;  %1251 = vmatprep.subr.bf16.mxu1 %v1530_v0 }
  0x73   :  { %1232 = vmatpush3.bf16.msra.mxu0 %v1380_v33  ;;  %1252 = vmatpush3.bf16.msra.mxu1 %v1381_v34 }
  0x74   :  { %1257 = vmatprep.subr.bf16.mxu0 %v1530_v0  ;;  %1277 = vmatprep.subr.bf16.mxu1 %v1530_v0 }
  0x76   :  { %1234 = vmatmul.mubr.bf16.vlgmr.msra.gmra.mxu0 %v79_v35  ;;  %1254 = vmatmul.mubr.bf16.vlgmr.msra.gmra.mxu1 %v80_v37 }
  0x77   :  { %1258 = vmatpush3.bf16.msra.mxu0 %v1382_v36  ;;  %1278 = vmatpush3.bf16.msra.mxu1 %v1383_v38 }
  0x78   :  { %1259 = vmatprep.subr.bf16.mxu0 %v1530_v0  ;;  %1279 = vmatprep.subr.bf16.mxu1 %v1530_v0 }
  0x79   :  { %1273 = vmatprep.mubr.msk.bf16.mxu0 %vm1531_vm0, %v1530_v0  ;;  %1293 = vmatprep.mubr.msk.bf16.mxu1 %vm1531_vm0, %v1530_v0 }
  0x7b   :  { %1260 = vmatpush3.bf16.msra.mxu0 %v1384_v39  ;;  %1280 = vmatpush3.bf16.msra.mxu1 %v1385_v40 }
  0x7c   :  { %1261 = vmatprep.subr.bf16.mxu0 %v1530_v0  ;;  %1281 = vmatprep.subr.bf16.mxu1 %v1530_v0 }
  0x7f   :  { %1262 = vmatpush3.bf16.msra.mxu0 %v1386_v41  ;;  %1282 = vmatpush3.bf16.msra.mxu1 %v1387_v42  ;;  %v1097_v42 = vld [vmem:[#allocation2] sm:$0xff]  }
  0x80   :  { %1263 = vmatprep.subr.bf16.mxu0 %v1530_v0  ;;  %1283 = vmatprep.subr.bf16.mxu1 %v1530_v0 }
  0x83   :  { %1264 = vmatpush3.bf16.msra.mxu0 %v1388_v43  ;;  %1284 = vmatpush3.bf16.msra.mxu1 %v1389_v44  ;;  %v1060_v43 = vld [vmem:[%s1685_s4] ss:$0 sm:$0xff]  ;;  %v1098_v44 = vunpack.c.l.bf16 %v1097_v42 }
  0x84   :  { %1265 = vmatprep.subr.bf16.mxu0 %v1530_v0  ;;  %1285 = vmatprep.subr.bf16.mxu1 %v1530_v0 }
  0x87   :  { %1266 = vmatpush3.bf16.msra.mxu0 %v1390_v45  ;;  %1286 = vmatpush3.bf16.msra.mxu1 %v1391_v46  ;;  %v1099_v46 = vunpack.c.h.bf16 %v1097_v42 }
  0x88   :  { %1267 = vmatprep.subr.bf16.mxu0 %v1530_v0  ;;  %1287 = vmatprep.subr.bf16.mxu1 %v1530_v0 }
  0x8b   :  { %1268 = vmatpush3.bf16.msra.mxu0 %v1392_v47  ;;  %1288 = vmatpush3.bf16.msra.mxu1 %v1393_v48 }
  0x8c   :  { %1269 = vmatprep.subr.bf16.mxu0 %v1530_v0  ;;  %1289 = vmatprep.subr.bf16.mxu1 %v1530_v0 }
  0x8f   :  { %1270 = vmatpush3.bf16.msra.mxu0 %v1394_v49  ;;  %1290 = vmatpush3.bf16.msra.mxu1 %v1395_v50 }
  0x90   :  { %1271 = vmatprep.subr.bf16.mxu0 %v1530_v0  ;;  %1291 = vmatprep.subr.bf16.mxu1 %v1530_v0 }
  0x93   :  { %1272 = vmatpush3.bf16.msra.mxu0 %v1396_v51  ;;  %1292 = vmatpush3.bf16.msra.mxu1 %v1397_v52 }
  0x94   :  { %1297 = vmatprep.subr.bf16.mxu0 %v1530_v0  ;;  %1317 = vmatprep.subr.bf16.mxu1 %v1530_v0 }
 0x116   :  { %v255_v55 = vpop.f32.mrf.mxu0  ;;  %v343_v57 = vpop.f32.mrf.mxu1 }
 0x117   :  { %v256_v56 = vadd.f32 %v1024_v53, %v255_v55  ;;  %v344_v58 = vadd.f32 %v1025_v54, %v343_v57 }
 0x118   :  { %v1195_v59 = vpop.f32.mrf.mxu0  ;;  %v1215_v61 = vpop.f32.mrf.mxu1 }
 0x119   :  { %v525_v60 = vmul.f32 0.01, %v256_v56  ;;  %v526_v62 = vmul.f32 0.01, %v344_v58 }
 0x11a   :  { %v258_v63 = vpop.f32.mrf.mxu0  ;;  %v346_v2 = vpop.f32.mrf.mxu1 }
 0x11b   :  { %v529_v1 = vmax.f32 %v256_v56, %v525_v60  ;;  %v530_v3 = vmax.f32 %v344_v58, %v526_v62  ;;  %v1104_v62 = vld [vmem:[#allocation2 + $0x8] sm:$0xff]   ;;  %v1062_v63 = vld [vmem:[%s1685_s4 + $0x2] ss:$0 sm:$0xff]  ;;  %v1063_v2 = vld [vmem:[%s1685_s4 + $0x3] ss:$0 sm:$0xff] }
 0x11c   :  { %v1196_v4 = vpop.f32.mrf.mxu0  ;;  %v1216_v7 = vpop.f32.mrf.mxu1 }
 0x11d   :  { %v533_v6 = vpack.c.bf16 %v529_v1, %v529_v1  ;;  %v534_v9 = vpack.c.bf16 %v530_v3, %v530_v3  ;;  %v1102_v1 = vunpack.c.l.bf16 %v1104_v62  ;;  %v1103_v4 = vunpack.c.h.bf16 %v1104_v62 }
 0x11f   :  { %1274 = vmatmul.mubr.bf16.vlgmr.msra.gmra.mxu0 %v533_v6  ;;  %1294 = vmatmul.mubr.bf16.vlgmr.msra.gmra.mxu1 %v534_v9 }
 0x120   :  { %1298 = vmatpush3.bf16.msra.mxu0 %v1398_v5  ;;  %1318 = vmatpush3.bf16.msra.mxu1 %v1399_v8 }
 0x121   :  { %1299 = vmatprep.subr.bf16.mxu0 %v1530_v0  ;;  %1319 = vmatprep.subr.bf16.mxu1 %v1530_v0 }
 0x122   :  { %1313 = vmatprep.mubr.msk.bf16.mxu0 %vm1531_vm0, %v1530_v0  ;;  %1333 = vmatprep.mubr.msk.bf16.mxu1 %vm1531_vm0, %v1530_v0 }
 0x124   :  { %1300 = vmatpush3.bf16.msra.mxu0 %v1400_v10  ;;  %1320 = vmatpush3.bf16.msra.mxu1 %v1401_v11 }
 0x125   :  { %1301 = vmatprep.subr.bf16.mxu0 %v1530_v0  ;;  %1321 = vmatprep.subr.bf16.mxu1 %v1530_v0 }
 0x128   :  { %1302 = vmatpush3.bf16.msra.mxu0 %v1402_v12  ;;  %1322 = vmatpush3.bf16.msra.mxu1 %v1403_v13 }
 0x129   :  { %1303 = vmatprep.subr.bf16.mxu0 %v1530_v0  ;;  %1323 = vmatprep.subr.bf16.mxu1 %v1530_v0 }
 0x12c   :  { %1304 = vmatpush3.bf16.msra.mxu0 %v1404_v14  ;;  %1324 = vmatpush3.bf16.msra.mxu1 %v1405_v15 }
 0x12d   :  { %1305 = vmatprep.subr.bf16.mxu0 %v1530_v0  ;;  %1325 = vmatprep.subr.bf16.mxu1 %v1530_v0 }
 0x130   :  { %1306 = vmatpush3.bf16.msra.mxu0 %v1406_v16  ;;  %1326 = vmatpush3.bf16.msra.mxu1 %v1407_v17 }
 0x131   :  { %1307 = vmatprep.subr.bf16.mxu0 %v1530_v0  ;;  %1327 = vmatprep.subr.bf16.mxu1 %v1530_v0 }
 0x134   :  { %1308 = vmatpush3.bf16.msra.mxu0 %v1408_v18  ;;  %1328 = vmatpush3.bf16.msra.mxu1 %v1409_v19 }
 0x135   :  { %1309 = vmatprep.subr.bf16.mxu0 %v1530_v0  ;;  %1329 = vmatprep.subr.bf16.mxu1 %v1530_v0 }
 0x136   :  { %v431_v24 = vpop.f32.mrf.mxu0  ;;  %v519_v26 = vpop.f32.mrf.mxu1 }
 0x137   :  { %v432_v25 = vadd.f32 %v1026_v20, %v431_v24  ;;  %v520_v27 = vadd.f32 %v1027_v22, %v519_v26 }
 0x138   :  { %v1235_v28 = vpop.f32.mrf.mxu0  ;;  %1310 = vmatpush3.bf16.msra.mxu0 %v1410_v21  ;;  %v1255_v31 = vpop.f32.mrf.mxu1  ;;  %1330 = vmatpush3.bf16.msra.mxu1 %v1411_v23 }
 0x139   :  { %v527_v30 = vmul.f32 0.01, %v432_v25  ;;  %1311 = vmatprep.subr.bf16.mxu0 %v1530_v0  ;;  %v528_v33 = vmul.f32 0.01, %v520_v27  ;;  %1331 = vmatprep.subr.bf16.mxu1 %v1530_v0  ;;  %v1061_v0 = vld [vmem:[%s1685_s4 + $0x1] ss:$0 sm:$0xff] }
 0x13a   :  { %v434_v34 = vpop.f32.mrf.mxu0  ;;  %v522_v36 = vpop.f32.mrf.mxu1  ;;  %s1494_s4 = scalar_lea.vmem %s1011_s22, 512 }
 0x13b   :  { %v531_v35 = vmax.f32 %v432_v25, %v527_v30  ;;  %v532_v37 = vmax.f32 %v520_v27, %v528_v33  ;;  %p1495_p6 = scmp.ne.s32.totalorder %s1011_s22, %s1494_s4  ;;  %p1500_p8 = scmp.lt.s32.totalorder %s1494_s4, %s1494_s4 }
 0x13c   :  { %v1236_v38 = vpop.f32.mrf.mxu0  ;;  %1312 = vmatpush3.bf16.msra.mxu0 %v1412_v29  ;;  %v1256_v40 = vpop.f32.mrf.mxu1  ;;  %1332 = vmatpush3.bf16.msra.mxu1 %v1413_v32 }
 0x13d   :  { %v535_v39 = vpack.c.bf16 %v531_v35, %v531_v35  ;;  %v536_v41 = vpack.c.bf16 %v532_v37, %v532_v37  ;;  %p1501_p9 = por %p1500_p8, %p1499_p7 }
 0x13f   :  { %1314 = vmatmul.mubr.bf16.vlgmr.msra.gmra.mxu0 %v535_v39  ;;  %1334 = vmatmul.mubr.bf16.vlgmr.msra.gmra.mxu1 %v536_v41  ;;  %p1502_p10 = pnand %p1501_p9, %p1495_p6 }
 0x1df   :  { %v711_v45 = vpop.f32.mrf.mxu0  ;;  %v799_v48 = vpop.f32.mrf.mxu1 }
 0x1e0   :  { %v712_v47 = vadd.f32 %v1060_v43, %v711_v45  ;;  %v800_v49 = vadd.f32 %v1061_v0, %v799_v48 }
 0x1e1   :  { %v1275_v50 = vpop.f32.mrf.mxu0  ;;  %v1295_v52 = vpop.f32.mrf.mxu1 }
 0x1e2   :  { %v989_v51 = vadd.f32 %v1098_v44, %v712_v47  ;;  %v990_v53 = vadd.f32 %v1099_v46, %v800_v49 }
 0x1e3   :  { %v714_v54 = vpop.f32.mrf.mxu0  ;;  %v802_v56 = vpop.f32.mrf.mxu1 }
 0x1e4   :  { %v993_v55 = vmul.f32 0.01, %v989_v51  ;;  %v994_v57 = vmul.f32 0.01, %v990_v53 }
 0x1e5   :  { %v1276_v58 = vpop.f32.mrf.mxu0  ;;  %v1296_v60 = vpop.f32.mrf.mxu1 }
 0x1e6   :  { %v997_v59 = vmax.f32 %v989_v51, %v993_v55  ;;  %v998_v61 = vmax.f32 %v990_v53, %v994_v57 }
 0x1e8   :  { %1001 = vst [vmem:[#allocation10] sm:$0xff] %v997_v59  ;;  %1002 = vst [vmem:[#allocation10 + $0x8] sm:$0xff] %v998_v61 }
 0x1ff   :  { %v887_v3 = vpop.f32.mrf.mxu0  ;;  %v975_v6 = vpop.f32.mrf.mxu1 }
 0x200   :  { %v888_v5 = vadd.f32 %v1062_v63, %v887_v3  ;;  %v976_v7 = vadd.f32 %v1063_v2, %v975_v6 }
 0x201   :  { %v1315_v8 = vpop.f32.mrf.mxu0  ;;  %v1335_v10 = vpop.f32.mrf.mxu1 }
 0x202   :  { %v991_v9 = vadd.f32 %v1102_v1, %v888_v5  ;;  %v992_v11 = vadd.f32 %v1103_v4, %v976_v7 }
 0x203   :  { %v890_v12 = vpop.f32.mrf.mxu0  ;;  %v978_v14 = vpop.f32.mrf.mxu1 }
 0x204   :  { %v995_v13 = vmul.f32 0.01, %v991_v9  ;;  %v996_v15 = vmul.f32 0.01, %v992_v11 }
 0x205   :  { %v1316_v16 = vpop.f32.mrf.mxu0  ;;  %v1336_v18 = vpop.f32.mrf.mxu1 }
 0x206   :  { %v999_v17 = vmax.f32 %v991_v9, %v995_v13  ;;  %v1000_v19 = vmax.f32 %v992_v11, %v996_v15 }
 0x208   :  { %1003 = vst [vmem:[#allocation10 + $0x10] sm:$0xff] %v999_v17  ;;  %1004 = vst [vmem:[#allocation10 + $0x18] sm:$0xff] %v1000_v19 }
 0x209   :  { %1505 = shalt.err (!%p1502_p10)
}
 0x20a   :  { %s1533_s23 = smov 128   ;;  %s1534_s24 = smov 8  }
 0x20b   :  { %1016 = dma.vmem_to_hbm [thread:$0]  %s1011_s22, 512, %s1686_s5, [#allocation4], %s1533_s23, %s1533_s23, %s1534_s24  }
 0x20c   :  { %1520 = dma.done.wait [#allocation4], 512  }
 0x20d   :  { %1521 = vsyncadd [#allocation4], 4294966784 }
 0x20e   :  { %1020 = vsyncpa [#allocation3], 1 }
 0x20f   :  { %1021 = vsyncpa [#allocation6], 1 }
 0x210   :  { %1022 = vsyncpa [#allocation9], 1 }
 0x211   :  { %1023 = vsyncpa [#allocation4], 1 }

</bundles_post_ra>
